<compile_context>
chip_gen: v6e
topology: v6e:2x2x1
jax: 0.10.0
libtpu: 0.0.40
codegen_flags: <defaults>
</compile_context>

<pallas_src>
import functools
import itertools

import numpy as np
import jax
import jax.numpy as jnp
from jax import lax
from jax.experimental import pallas as pl
from jax.experimental.pallas import tpu as pltpu


def _round_up(x, m):
    return ((x + m - 1) // m) * m


def _eo_gap_kernel(lab_ref, bp_ref, out_ref, loss_ref, acc_ref, *, num_classes):
    C = num_classes
    i = pl.program_id(0)

    @pl.when(i == 0)
    def _():
        acc_ref[...] = jnp.zeros_like(acc_ref)

    lab = lab_ref[...]                                   # (1, N_BLK) int32
    bp = bp_ref[...]                                     # (1, N_BLK) int32
    O = out_ref[...].astype(jnp.float32)                 # (N_BLK, S)
    n_blk = lab.shape[1]

    # Build the fused (2C, N_BLK) mask LHS in-register (no HBM one-hot):
    #   rows 0..C-1  : [label == c] & [bp != label]   (numerator weights)
    #   rows C..2C-1 : [label == c]                   (denominator weights)
    row = lax.broadcasted_iota(jnp.int32, (2 * C, n_blk), 0)
    cls_idx = jnp.where(row < C, row, row - C)           # class id per row
    onehot = lab == cls_idx                              # (2C, N_BLK) bool
    wrong = bp != lab                                    # (1, N_BLK) bool
    keep = jnp.logical_or(row >= C, wrong)               # numerator rows gated by wrong
    lhs = jnp.logical_and(onehot, keep).astype(jnp.float32)   # (2C, N_BLK)

    # Single MXU pass, canonical (M,K)x(K,N) layout: (2C, N_BLK) @ (N_BLK, S)
    partial = lax.dot_general(lhs, O, (((1,), (0,)), ((), ())),
                              preferred_element_type=jnp.float32)   # (2C, S)
    acc_ref[...] += partial

    @pl.when(i == pl.num_programs(0) - 1)
    def _():
        acc = acc_ref[...]                               # (2C, S)
        num = acc[:C, :]                                 # (C, S)
        den = acc[C:, :]                                 # (C, S)
        # NOTE: den == 0 (class absent in batch) yields Inf/NaN, matching PyTorch.
        demP = num / den                                 # (C, S)
        S = demP.shape[1]
        # sum over subgroup pairs (a<b) of (x_a - x_b)^2 == S*sum(x^2) - (sum x)^2
        sum_x = jnp.sum(demP, axis=1, keepdims=True)     # (C, 1)
        sum_x2 = jnp.sum(demP * demP, axis=1, keepdims=True)
        gaps_per_class = S * sum_x2 - sum_x * sum_x      # (C, 1)
        n_combs = S * (S - 1) // 2
        total = jnp.sum(gaps_per_class, axis=0, keepdims=True)      # (1, 1)
        loss_ref[...] = -(total / jnp.float32(C * n_combs))


def equalized_odds_gap(output, biased_predictions, labels, num_classes,
                       num_subgroups, *, block_n=4096):
    """Pallas implementation of EqualizedOddsGap.forward with agg=None (default)."""
    if num_subgroups < 2:
        raise ValueError("num_subgroups must be >= 2 (n_combs would be 0).")
    N, S = output.shape
    assert S == num_subgroups, "output second dim must equal num_subgroups"

    # Block size: multiple of 128 (lane-aligned for the (1, N) label rows), capped
    # by the (128-rounded) sample count. Default 4096 keeps VMEM use well under the
    # scoped limit on v5e (16 MiB) / v6e (32 MiB) / v7x (32 MiB).
    n_blk = min(_round_up(block_n, 128), _round_up(N, 128))
    n_pad = _round_up(N, n_blk)

    out_f = output.astype(jnp.float32)
    lab_i = labels.astype(jnp.int32)
    bp_i = biased_predictions.astype(jnp.int32)
    if n_pad != N:
        # Zero-padded output rows contribute 0 to both numerator and denominator.
        out_f = jnp.pad(out_f, ((0, n_pad - N), (0, 0)))
        lab_i = jnp.pad(lab_i, (0, n_pad - N))
        bp_i = jnp.pad(bp_i, (0, n_pad - N))
    lab2 = lab_i.reshape(1, n_pad)
    bp2 = bp_i.reshape(1, n_pad)

    grid = (n_pad // n_blk,)
    kernel = functools.partial(_eo_gap_kernel, num_classes=num_classes)

    out = pl.pallas_call(
        kernel,
        out_shape=jax.ShapeDtypeStruct((1, 1), jnp.float32),
        grid_spec=pltpu.PrefetchScalarGridSpec(
            num_scalar_prefetch=0,
            grid=grid,
            in_specs=[
                pl.BlockSpec((1, n_blk), lambda i: (0, i)),      # labels (1, N)
                pl.BlockSpec((1, n_blk), lambda i: (0, i)),      # biased preds (1, N)
                pl.BlockSpec((n_blk, S), lambda i: (i, 0)),      # output (N, S)
            ],
            out_specs=pl.BlockSpec((1, 1), lambda i: (0, 0)),    # resident accumulator-style output
            scratch_shapes=[pltpu.VMEM((2 * num_classes, S), jnp.float32)],
        ),
        compiler_params=pltpu.CompilerParams(
            dimension_semantics=("arbitrary",),                  # N is a reduction axis
            vmem_limit_bytes=32 * 1024 * 1024,
        ),
    )(lab2, bp2, out_f)
    return out[0, 0]


def _reference_eo_gap(output, biased_predictions, labels, num_classes, num_subgroups):
    """Pure numpy port of the PyTorch forward (agg=None) for validation."""
    output = np.asarray(output, dtype=np.float64)
    bp_oh = np.eye(num_classes, dtype=np.float64)[np.asarray(biased_predictions)]
    lab_oh = np.eye(num_classes, dtype=np.float64)[np.asarray(labels)]
    n_combs = num_subgroups * (num_subgroups - 1) // 2
    gaps = np.zeros((num_classes, n_combs), dtype=np.float64)
    for i in range(num_classes):
        class_oh = np.eye(num_classes, dtype=np.float64)[i]
        other = 1.0 - class_oh
        for j, (sg0, sg1) in enumerate(itertools.combinations(range(num_subgroups), 2)):
            w = (other * bp_oh).sum(1) * (class_oh * lab_oh).sum(1)
            d0 = (w * output[:, sg0]).sum() / ((class_oh * lab_oh).sum(1) * output[:, sg0]).sum()
            d1 = (w * output[:, sg1]).sum() / ((class_oh * lab_oh).sum(1) * output[:, sg1]).sum()
            gaps[i, j] = (d0 - d1) ** 2
    loss = gaps.sum() / (num_classes * n_combs)
    return -loss


if __name__ == "__main__":
    num_classes = 4
    num_subgroups = 3   # -> n_combs = 3

    key = jax.random.PRNGKey(0)
    # (N, block_n): second case forces padding + a multi-step pipelined accumulation.
    for N, blk in ((64, 4096), (300, 128)):
        k_out, k_bp, k_lab, key = jax.random.split(key, 4)
        # Soft subgroup membership weights (positive, rows sum to 1).
        output = jax.nn.softmax(jax.random.normal(k_out, (N, num_subgroups)), axis=-1)
        biased_predictions = jax.random.randint(k_bp, (N,), 0, num_classes, dtype=jnp.int32)
        labels = jax.random.randint(k_lab, (N,), 0, num_classes, dtype=jnp.int32)

        result = equalized_odds_gap(output, biased_predictions, labels,
                                    num_classes, num_subgroups, block_n=blk)
        result = jax.block_until_ready(result)

        expected = _reference_eo_gap(np.array(output), np.array(biased_predictions),
                                     np.array(labels), num_classes, num_subgroups)
        assert np.isfinite(float(result)), "kernel produced non-finite result"
        np.testing.assert_allclose(float(result), expected, rtol=1e-4, atol=1e-5)

    print("KERNEL_OK")
</pallas_src>

<mosaic_0001>
module attributes {stable_mosaic.version = 11 : i64} {
  func.func @_eo_gap_kernel(%arg0: i32, %arg1: memref<1x128xi32, #tpu.memory_space<vmem>>, %arg2: memref<1x128xi32, #tpu.memory_space<vmem>>, %arg3: memref<128x3xf32, #tpu.memory_space<vmem>>, %arg4: memref<1x1xf32, #tpu.memory_space<vmem>>, %arg5: memref<8x3xf32, #tpu.memory_space<vmem>>) attributes {dimension_semantics = [#tpu.dimension_semantics<arbitrary>], iteration_bounds = array<i64: 1>, scalar_prefetch = 0 : i64, scratch_operands = 1 : i64, tpu.core_type = #tpu.core_type<tc>, window_params = [{transform_indices = @transform_0, window_bounds = array<i64: 1, 128>}, {transform_indices = @transform_1, window_bounds = array<i64: 1, 128>}, {transform_indices = @transform_2, window_bounds = array<i64: 128, 3>}, {pipeline_mode = #tpu.pipeline_mode<synchronous>, transform_indices = @transform_3, window_bounds = array<i64: 1, 1>}]} {
    %c0_i32 = arith.constant 0 : i32
    %0 = arith.cmpi eq, %arg0, %c0_i32 : i32
    %1 = arith.extui %0 : i1 to i32
    %c0_i32_0 = arith.constant 0 : i32
    %2 = arith.cmpi ne, %1, %c0_i32_0 : i32
    scf.if %2 {
      %cst_14 = arith.constant 0.000000e+00 : f32
      %29 = vector.broadcast %cst_14 : f32 to vector<8x3xf32>
      %c0_15 = arith.constant 0 : index
      %c0_16 = arith.constant 0 : index
      %30 = vector.load %arg5[%c0_15, %c0_16] : memref<8x3xf32, #tpu.memory_space<vmem>>, vector<8x3xf32>
      tpu.vector_store %arg5[%c0_15, %c0_16], %29 {strides = array<i32>} : memref<8x3xf32, #tpu.memory_space<vmem>>, vector<8x3xf32>,
    } else {
    }
    %c0 = arith.constant 0 : index
    %c0_1 = arith.constant 0 : index
    %3 = vector.load %arg1[%c0, %c0_1] : memref<1x128xi32, #tpu.memory_space<vmem>>, vector<1x128xi32>
    %c0_2 = arith.constant 0 : index
    %c0_3 = arith.constant 0 : index
    %4 = vector.load %arg2[%c0_2, %c0_3] : memref<1x128xi32, #tpu.memory_space<vmem>>, vector<1x128xi32>
    %c0_4 = arith.constant 0 : index
    %c0_5 = arith.constant 0 : index
    %5 = vector.load %arg3[%c0_4, %c0_5] : memref<128x3xf32, #tpu.memory_space<vmem>>, vector<128x3xf32>
    %6 = tpu.iota {dimensions = array<i32: 0>} : vector<8x128xi32>
    %c4_i32 = arith.constant 4 : i32
    %7 = vector.broadcast %c4_i32 : i32 to vector<8x128xi32>
    %8 = arith.cmpi slt, %6, %7 : vector<8x128xi32>
    %c4_i32_6 = arith.constant 4 : i32
    %9 = vector.broadcast %c4_i32_6 : i32 to vector<8x128xi32>
    %10 = arith.subi %6, %9 : vector<8x128xi32>
    %11 = arith.select %8, %6, %10 : vector<8x128xi1>, vector<8x128xi32>
    %12 = vector.broadcast %3 : vector<1x128xi32> to vector<8x128xi32>
    %13 = arith.cmpi eq, %12, %11 : vector<8x128xi32>
    %14 = arith.cmpi ne, %4, %3 : vector<1x128xi32>
    %c4_i32_7 = arith.constant 4 : i32
    %15 = vector.broadcast %c4_i32_7 : i32 to vector<8x128xi32>
    %16 = arith.cmpi sge, %6, %15 : vector<8x128xi32>
    %17 = vector.broadcast %14 : vector<1x128xi1> to vector<8x128xi1>
    %18 = arith.ori %16, %17 : vector<8x128xi1>
    %19 = arith.andi %13, %18 : vector<8x128xi1>
    %20 = arith.extui %19 : vector<8x128xi1> to vector<8x128xi32>
    %21 = arith.sitofp %20 : vector<8x128xi32> to vector<8x128xf32>
    %cst = arith.constant dense<0.000000e+00> : vector<8x3xf32>
    %22 = tpu.matmul %21, %5, %cst {dimension_numbers = #tpu.dot_dimension_numbers<[1], [0], [0], [1], [0, 0, 1, 1], [], []>} : vector<8x128xf32>, vector<128x3xf32>, vector<8x3xf32> -> vector<8x3xf32>
    %c0_8 = arith.constant 0 : index
    %c0_9 = arith.constant 0 : index
    %23 = vector.load %arg5[%c0_8, %c0_9] : memref<8x3xf32, #tpu.memory_space<vmem>>, vector<8x3xf32>
    %24 = arith.addf %23, %22 : vector<8x3xf32>
    %c0_10 = arith.constant 0 : index
    %c0_11 = arith.constant 0 : index
    %25 = vector.load %arg5[%c0_10, %c0_11] : memref<8x3xf32, #tpu.memory_space<vmem>>, vector<8x3xf32>
    tpu.vector_store %arg5[%c0_10, %c0_11], %24 {strides = array<i32>} : memref<8x3xf32, #tpu.memory_space<vmem>>, vector<8x3xf32>,
    %c0_i32_12 = arith.constant 0 : i32
    %26 = arith.cmpi eq, %arg0, %c0_i32_12 : i32
    %27 = arith.extui %26 : i1 to i32
    %c0_i32_13 = arith.constant 0 : i32
    %28 = arith.cmpi ne, %27, %c0_i32_13 : i32
    scf.if %28 {
      %c0_14 = arith.constant 0 : index
      %c0_15 = arith.constant 0 : index
      %29 = vector.load %arg5[%c0_14, %c0_15] : memref<8x3xf32, #tpu.memory_space<vmem>>, vector<8x3xf32>
      %30 = vector.extract_strided_slice %29 {offsets = [0, 0], sizes = [4, 3], strides = [1, 1]} : vector<8x3xf32> to vector<4x3xf32>
      %31 = vector.extract_strided_slice %29 {offsets = [4, 0], sizes = [4, 3], strides = [1, 1]} : vector<8x3xf32> to vector<4x3xf32>
      %32 = arith.divf %30, %31 : vector<4x3xf32>
      %cst_16 = arith.constant dense<0.000000e+00> : vector<4xf32>
      %33 = vector.multi_reduction <add>, %32, %cst_16 [1] : vector<4x3xf32> to vector<4xf32>
      %34 = vector.shape_cast %33 : vector<4xf32> to vector<4x1xf32>
      %35 = arith.mulf %32, %32 : vector<4x3xf32>
      %cst_17 = arith.constant dense<0.000000e+00> : vector<4xf32>
      %36 = vector.multi_reduction <add>, %35, %cst_17 [1] : vector<4x3xf32> to vector<4xf32>
      %37 = vector.shape_cast %36 : vector<4xf32> to vector<4x1xf32>
      %cst_18 = arith.constant 3.000000e+00 : f32
      %38 = vector.broadcast %cst_18 : f32 to vector<4x1xf32>
      %39 = arith.mulf %38, %37 : vector<4x1xf32>
      %40 = arith.mulf %34, %34 : vector<4x1xf32>
      %41 = arith.subf %39, %40 : vector<4x1xf32>
      %cst_19 = arith.constant dense<0.000000e+00> : vector<1xf32>
      %42 = vector.multi_reduction <add>, %41, %cst_19 [0] : vector<4x1xf32> to vector<1xf32>
      %43 = vector.shape_cast %42 : vector<1xf32> to vector<1x1xf32>
      %cst_20 = arith.constant 1.200000e+01 : f32
      %44 = vector.broadcast %cst_20 : f32 to vector<1x1xf32>
      %45 = arith.divf %43, %44 : vector<1x1xf32>
      %cst_21 = arith.constant 0.000000e+00 : f32
      %46 = vector.broadcast %cst_21 : f32 to vector<1x1xf32>
      %47 = arith.subf %46, %45 : vector<1x1xf32>
      %c0_22 = arith.constant 0 : index
      %c0_23 = arith.constant 0 : index
      %48 = vector.load %arg4[%c0_22, %c0_23] : memref<1x1xf32, #tpu.memory_space<vmem>>, vector<1x1xf32>
      tpu.vector_store %arg4[%c0_22, %c0_23], %47 {strides = array<i32>} : memref<1x1xf32, #tpu.memory_space<vmem>>, vector<1x1xf32>,
    } else {
    }
    return
  }
  func.func @transform_0(%arg0: i32) -> (i32, i32) {
    %c0_i32 = arith.constant 0 : i32
    %c0_i32_0 = arith.constant 0 : i32
    return %c0_i32, %arg0 : i32, i32
  }
  func.func @transform_1(%arg0: i32) -> (i32, i32) {
    %c0_i32 = arith.constant 0 : i32
    %c0_i32_0 = arith.constant 0 : i32
    return %c0_i32, %arg0 : i32, i32
  }
  func.func @transform_2(%arg0: i32) -> (i32, i32) {
    %c0_i32 = arith.constant 0 : i32
    %c0_i32_0 = arith.constant 0 : i32
    return %arg0, %c0_i32 : i32, i32
  }
  func.func @transform_3(%arg0: i32) -> (i32, i32) {
    %c0_i32 = arith.constant 0 : i32
    %c0_i32_0 = arith.constant 0 : i32
    %c0_i32_1 = arith.constant 0 : i32
    return %c0_i32, %c0_i32_0 : i32, i32
  }
}

</mosaic_0001>

<bundles_post_ra>
// kernel: tpu_custom_call.1
= control target key start
LH: loop header
LB: loop body
LE: loop exit
PB: predicated region body
PF: predicated region fallthrough
CT: control target
= control target key end

     0   :  { %v266_v1 = vmov 0.0   ;;  %vm267_vm0 = vmmov 0   ;;  %vm19_vm1 = vcmask 23552   ;;  %s368_s0 = inlined_call_operand.vmem [shape: s32[1,128], index: 0, kind: input, shape index: {}]   ;;  %s369_s1 = inlined_call_operand.vmem [shape: s32[1,128], index: 1, kind: input, shape index: {}]   ;;  %s370_s2 = inlined_call_operand.vmem [shape: f32[128,3], index: 2, kind: input, shape index: {}]   ;;  %s371_s3 = inlined_call_operand.hbm [shape: f32[1,1], index: 3, kind: output, shape index: {}]  }
   0x1   :  { %v38_v0 = vld [vmem:[%s370_s2 + $0x78] sm:$0xff]  ;;  %202 = vmatprep.subr.mxu0 %v266_v1  ;;  %v37_v2 = vld [vmem:[%s370_s2 + $0x70] sm:$0xff]  ;;  %234 = vmatprep.mubr.msk.f32.mxu0 %vm267_vm0, %v266_v1  ;;  %20 = vst.msk [vmem:[#allocation2] sm:$0xff] %vm19_vm1, %v266_v1  ;;  %v36_v3 = vld [vmem:[%s370_s2 + $0x68] sm:$0xff] }
   0x2   :  { %203 = vmatpush3.msra.mxu0 %v38_v0  ;;  %v35_v4 = vld [vmem:[%s370_s2 + $0x60] sm:$0xff] }
   0x3   :  { %204 = vmatprep.subr.mxu0 %v266_v1 }
   0x4   :  { %205 = vmatpush3.msra.mxu0 %v37_v2 }
   0x5   :  { %206 = vmatprep.subr.mxu0 %v266_v1 }
   0x6   :  { %207 = vmatpush3.msra.mxu0 %v36_v3 }
   0x7   :  { %8 = vsyncpa [#allocation4], 0  ;;  %208 = vmatprep.subr.mxu0 %v266_v1  ;;  %v34_v5 = vld [vmem:[%s370_s2 + $0x58] sm:$0xff]  ;;  %v39_v6 = vlaneseq  ;;  %v33_v7 = vld [vmem:[%s370_s2 + $0x50] sm:$0xff]  ;;  %v268_v16 = vmov 0   ;;  %v269_v28 = vmov 1.0  }
   0x8   :  { %209 = vmatpush3.msra.mxu0 %v35_v4  ;;  %v32_v8 = vld [vmem:[%s370_s2 + $0x48] sm:$0xff]  ;;  %v21_v9 = vld [vmem:[%s368_s0] sm:$0x1]  ;;  %v30_v13 = vld [vmem:[%s370_s2 + $0x38] sm:$0xff]  ;;  %vm144_vm9 = vcmask 19456   ;;  %vm155_vm10 = vcmask 1043456  }
   0x9   :  { %210 = vmatprep.subr.mxu0 %v266_v1  ;;  %v22_v10 = vld [vmem:[%s369_s1] sm:$0x1]  ;;  %v40_v11 = vshrl.u32 %v39_v6, 7  ;;  %v29_v15 = vld [vmem:[%s370_s2 + $0x30] sm:$0xff]  ;;  %v28_v18 = vld [vmem:[%s370_s2 + $0x28] sm:$0xff]  ;;  %vm166_vm11 = vcmask 0  }
   0xa   :  { %211 = vmatpush3.msra.mxu0 %v34_v5  ;;  %v31_v12 = vld [vmem:[%s370_s2 + $0x40] sm:$0xff]  ;;  %vm49_vm2 = vcmp.ne.s32.totalorder %v22_v10, %v21_v9  ;;  %v26_v22 = vld [vmem:[%s370_s2 + $0x18] sm:$0xff]  ;;  %v25_v25 = vld [vmem:[%s370_s2 + $0x10] sm:$0xff] }
   0xb   :  { %212 = vmatprep.subr.mxu0 %v266_v1  ;;  %v46_v14 = vsub.s32 0, %v40_v11  ;;  %v51_v17 = vsel %vm49_vm2, 1, %v268_v16  ;;  %v182_v19 = vadd.s32 4294967292, %v40_v11  ;;  %v27_v21 = vld [vmem:[%s370_s2 + $0x20] sm:$0xff]  ;;  %vm41_vm3 = vcmp.lt.s32.totalorder %v40_v11, 4  ;;  %v24_v26 = vld [vmem:[%s370_s2 + $0x8] sm:$0xff] }
   0xc   :  { %213 = vmatpush3.msra.mxu0 %v33_v7  ;;  %vm50_vm4 = vcmp.ge.s32.totalorder %v40_v11, 4  ;;  %v23_v27 = vld [vmem:[%s370_s2] sm:$0xff]  ;;  %s270_s2 = smov [#allocation3]  }
   0xd   :  { %214 = vmatprep.subr.mxu0 %v266_v1  ;;  %v55_v20 = vrot.slane %v51_v17, %v46_v14  ;;  %v47_v23 = vrot.slane %v21_v9, %v46_v14  ;;  %v43_v24 = vsel %vm41_vm3, %v40_v11, %v182_v19  ;;  %v131_v29 = vld [vmem:[#allocation2] sm:$0xff]  ;;  %s174_s19 = sshll.u32 %s270_s2, 4  ;;  %s175_s19 = int_to_ptr.vmem [resolvable:$true] %s174_s19 }
   0xe   :  { %215 = vmatpush3.msra.mxu0 %v32_v8  ;;  %s244_s20 = scalar_lea.vmem %s175_s19, 16  ;;  %s248_s21 = scalar_lea.vmem %s175_s19, 32 }
   0xf   :  { %216 = vmatprep.subr.mxu0 %v266_v1  ;;  %vm56_vm5 = vcmp.eq.s32.totalorder %v55_v20, 1  ;;  %vm48_vm6 = vcmp.eq.s32.totalorder %v47_v23, %v43_v24  ;;  %p245_p0 = scmp.ne.s32.totalorder %s175_s19, %s244_s20  ;;  %p249_p1 = scmp.lt.s32.totalorder %s175_s19, %s175_s19 }
  0x10   :  { %217 = vmatpush3.msra.mxu0 %v31_v12  ;;  %vm57_vm7 = vmor %vm50_vm4, %vm56_vm5  ;;  %p250_p2 = scmp.lt.s32.totalorder %s248_s21, %s244_s20 }
  0x11   :  { %218 = vmatprep.subr.mxu0 %v266_v1  ;;  %vm58_vm8 = vmand %vm48_vm6, %vm57_vm7 }
  0x12   :  { %219 = vmatpush3.msra.mxu0 %v30_v13  ;;  %p251_p3 = por %p250_p2, %p249_p1 }
  0x13   :  { %220 = vmatprep.subr.mxu0 %v266_v1 }
  0x14   :  { %221 = vmatpush3.msra.mxu0 %v29_v15  ;;  %p252_p4 = pnand %p251_p3, %p245_p0 }
  0x15   :  { %222 = vmatprep.subr.mxu0 %v266_v1 }
  0x16   :  { %223 = vmatpush3.msra.mxu0 %v28_v18 }
  0x17   :  { %224 = vmatprep.subr.mxu0 %v266_v1 }
  0x18   :  { %225 = vmatpush3.msra.mxu0 %v27_v21 }
  0x19   :  { %226 = vmatprep.subr.mxu0 %v266_v1 }
  0x1a   :  { %227 = vmatpush3.msra.mxu0 %v26_v22 }
  0x1b   :  { %228 = vmatprep.subr.mxu0 %v266_v1 }
  0x1c   :  { %229 = vmatpush3.msra.mxu0 %v25_v25 }
  0x1d   :  { %230 = vmatprep.subr.mxu0 %v266_v1 }
  0x1e   :  { %231 = vmatpush3.msra.mxu0 %v24_v26 }
  0x1f   :  { %232 = vmatprep.subr.mxu0 %v266_v1 }
  0x20   :  { %233 = vmatpush3.msra.mxu0 %v23_v27 }
  0x21   :  { %235 = vmatmul.mubr.msk.f32.vlgmr.msra.gmra.mxu0 %vm58_vm8, %v269_v28 }
  0xe1   :  { %v127_v30 = vpop.f32.mrf.mxu0 }
  0xe2   :  { %v132_v31 = vadd.f32 %v131_v29, %v127_v30 }
  0xe3   :  { %v236_v32 = vpop.f32.mrf.mxu0 }
  0xe4   :  { %134 = vst.msk [vmem:[#allocation2] sm:$0xff] %vm19_vm1, %v132_v31 }
  0xeb   :  { %v138_v33 = vld [vmem:[#allocation2] sm:$0xff] }
  0xec   :  { %v140_v34 = vrot.slane %v138_v33, 4 }
  0xee   :  { %242 = vrcp.f32 %v140_v34 }
  0xfb   :  { %v243_v35 = vpop.eup %242 }
  0xfc   :  { %v143_v36 = vmul.f32 %v243_v35, %v138_v33 }
  0xfe   :  { %v145_v37 = vsel %vm144_vm9, %v143_v36, 0.0  ;;  %v148_v38 = vmul.f32 %v143_v36, %v143_v36 }
  0xff   :  { %146 = vadd.xlane.f32.xlu0 %v145_v37 }
 0x100   :  { %v149_v39 = vsel %vm144_vm9, %v148_v38, 0.0 }
 0x103   :  { %150 = vadd.xlane.f32.xlu0 %v149_v39 }
 0x188   :  { %v147_v40 = vpop.xlane.xlu0 %146 }
 0x189   :  { %v153_v42 = vmul.f32 %v147_v40, %v147_v40 }
 0x18c   :  { %v151_v41 = vpop.xlane.xlu0 %150 }
 0x18d   :  { %v152_v43 = vmul.f32 3.0, %v151_v41 }
 0x18f   :  { %v154_v44 = vsub.f32 %v152_v43, %v153_v42 }
 0x191   :  { %v156_v45 = vsel %vm155_vm10, %v154_v44, 0.0 }
 0x192   :  { %v157_v46 = vrot.slane %v156_v45, 4 }
 0x194   :  { %v158_v47 = vadd.f32 %v157_v46, %v156_v45 }
 0x196   :  { %v159_v48 = vrot.slane %v158_v47, 2 }
 0x198   :  { %v160_v49 = vadd.f32 %v159_v48, %v158_v47 }
 0x19a   :  { %v161_v50 = vrot.slane %v160_v49, 1 }
 0x19c   :  { %v162_v51 = vadd.f32 %v161_v50, %v160_v49 }
 0x19e   :  { %v164_v52 = vmul.f32 0.083333336, %v162_v51 }
 0x1a0   :  { %v165_v53 = vsub.f32 0.0, %v164_v52 }
 0x1a2   :  { %167 = vst.msk [vmem:[#allocation3] sm:$0x1] %vm166_vm11, %v165_v53 }
 0x1a3   :  { %255 = shalt.err (!%p252_p4)
}
 0x1a4   :  { %177 = dma.vmem_to_hbm [thread:$0]  %s175_s19, 16, %s371_s3, [#allocation4]  }
 0x1a5   :  { %264 = dma.done.wait [#allocation4], 16  }
 0x1a6   :  { %265 = vsyncadd [#allocation4], 4294967280 }
 0x1a7   :  { %181 = vsyncpa [#allocation4], 1 }

</bundles_post_ra>
